<compile_context>
chip_gen: v5e
topology: v5e:2x2
jax: 0.10.0
libtpu: 0.0.40
codegen_flags: <defaults>
</compile_context>

<pallas_src>
import jax
import jax.numpy as jnp
from jax.experimental import pallas as pl
from jax.experimental.pallas import tpu as pltpu


def _make_shortcut_kernel(nb):
    def kernel(x_ref, w_ref, shift_ref, res_ref, o_ref):
        # x_ref:     (NB, C_in,  TT)   native dtype (bf16/f32)
        # w_ref:     (C_out, C_in)     conv weight, BN scale folded, x dtype
        # shift_ref: (C_out, 1)        folded BN shift, f32
        # res_ref:   (NB, C_out, TT)   residual tile
        # o_ref:     (NB, C_out, TT)
        w = w_ref[...]
        shift = shift_ref[...]
        for n in range(nb):  # static unroll over the batch block
            # 1x1 conv == channel contraction; time stays lane-dense; f32 acc.
            y = jnp.dot(w, x_ref[n], preferred_element_type=jnp.float32)
            y = y + shift + res_ref[n].astype(jnp.float32)
            o_ref[n] = jnp.maximum(y, 0.0).astype(o_ref.dtype)
    return kernel


def _choose_time_tile(T, per_t_bytes, max_step_bytes=8 << 20):
    """Returns (T_pad, TT). T_pad >= T is the (possibly padded) time extent."""
    if T < 128:
        # Pad up to one full lane width -> unmasked full-width stores.
        return 128, 128
    if T % 128 != 0:
        # Full-extent block is legal; only the trailing partial vreg is masked.
        return T, T
    # Prefer the full contiguous extent (single contiguous DMA per operand).
    if T * per_t_bytes <= max_step_bytes:
        return T, T
    tt = 128
    while (T % (tt * 2) == 0) and ((tt * 2) * per_t_bytes <= max_step_bytes):
        tt *= 2
    return T, tt


def _choose_batch_block(N, n_time_blocks, step_bytes_nb1,
                        target_bytes=4 << 20, min_steps=8):
    """Grow the batch block while per-step bytes stay modest and the grid
    keeps enough steps to feed both TensorCores / the software pipeline."""
    nb = 1
    while True:
        nxt = nb * 2
        if N % nxt != 0:
            break
        if nxt * step_bytes_nb1 > target_bytes:
            break
        if (N // nxt) * n_time_blocks < min_steps:
            break
        nb = nxt
    return nb


def shortcut_layer_forward(input_tensor, output_tensor, conv_w, bn_gamma, bn_beta,
                           bn_mean, bn_var, *, in_maps, time_steps, eps=1e-5):
    """input_tensor: reshapable to (N, in_maps, time_steps, 1) [NCHW]
       output_tensor: (N, out_maps, time_steps, 1) [NCHW]
       conv_w: (out_maps, in_maps, 1, 1)
       returns: (N, out_maps, time_steps, 1)
    """
    out_maps = conv_w.shape[0]
    T = time_steps

    # Free reshapes only (drop trailing W=1); no data movement in HBM.
    x = input_tensor.reshape(-1, in_maps, T)            # (N, C_in,  T)
    N = x.shape[0]
    res = output_tensor.reshape(N, out_maps, T)         # (N, C_out, T)

    # Fold BN (eval mode) into the 1x1 conv: scale into the weight, keep shift.
    w = conv_w[:, :, 0, 0].astype(jnp.float32)                       # (C_out, C_in)
    inv_std = 1.0 / jnp.sqrt(bn_var.astype(jnp.float32) + eps)
    scale = bn_gamma.astype(jnp.float32) * inv_std                   # (C_out,)
    w_scaled = (w * scale[:, None]).astype(x.dtype)                  # native MXU dtype
    shift = (bn_beta.astype(jnp.float32)
             - bn_mean.astype(jnp.float32) * scale).reshape(out_maps, 1)
    # TODO(synk): training-mode BatchNorm (batch statistics) not implemented;
    # this is the eval-mode (running-stats) forward.

    out_dtype = jnp.result_type(input_tensor.dtype, output_tensor.dtype)

    # --- Tile selection (HBM-bound: maximize per-step bytes, keep grid fed) ---
    x_b = jnp.dtype(x.dtype).itemsize
    r_b = jnp.dtype(res.dtype).itemsize
    o_b = jnp.dtype(out_dtype).itemsize
    per_t_bytes = in_maps * x_b + out_maps * (r_b + o_b)   # bytes per time step, NB=1

    T_pad, TT = _choose_time_tile(T, per_t_bytes)
    if T_pad != T:
        pad = T_pad - T
        x = jnp.pad(x, ((0, 0), (0, 0), (0, pad)))
        res = jnp.pad(res, ((0, 0), (0, 0), (0, pad)))

    n_time_blocks = T_pad // TT
    NB = _choose_batch_block(N, n_time_blocks, TT * per_t_bytes)

    kernel = _make_shortcut_kernel(NB)

    out = pl.pallas_call(
        kernel,
        out_shape=jax.ShapeDtypeStruct((N, out_maps, T_pad), out_dtype),
        grid=(N // NB, n_time_blocks),
        in_specs=[
            pl.BlockSpec((NB, in_maps, TT), lambda n, t: (n, 0, t)),
            pl.BlockSpec((out_maps, in_maps), lambda n, t: (0, 0)),
            pl.BlockSpec((out_maps, 1), lambda n, t: (0, 0)),
            pl.BlockSpec((NB, out_maps, TT), lambda n, t: (n, 0, t)),
        ],
        out_specs=pl.BlockSpec((NB, out_maps, TT), lambda n, t: (n, 0, t)),
        compiler_params=pltpu.CompilerParams(
            dimension_semantics=("parallel", "parallel"),
            vmem_limit_bytes=48 << 20),
    )(x, w_scaled, shift, res)

    if T_pad != T:
        out = out[:, :, :T]

    # (N, C_out, T) -> (N, C_out, T, 1): free reshape.
    return out[..., None]


if __name__ == "__main__":
    key = jax.random.PRNGKey(0)
    batch, in_maps, out_maps, time_steps = 2, 4, 8, 16

    k1, k2, k3, _ = jax.random.split(key, 4)
    input_tensor = jax.random.normal(k1, (batch, in_maps, time_steps, 1), jnp.float32)
    output_tensor = jax.random.normal(k2, (batch, out_maps, time_steps, 1), jnp.float32)

    # Parameters (shapes from nn.Conv2d / nn.BatchNorm2d, PyTorch defaults).
    conv_w = jax.random.normal(k3, (out_maps, in_maps, 1, 1), jnp.float32) * 0.1
    bn_gamma = jnp.ones((out_maps,), jnp.float32)
    bn_beta = jnp.zeros((out_maps,), jnp.float32)
    bn_mean = jnp.zeros((out_maps,), jnp.float32)
    bn_var = jnp.ones((out_maps,), jnp.float32)

    out = shortcut_layer_forward(input_tensor, output_tensor, conv_w,
                                 bn_gamma, bn_beta, bn_mean, bn_var,
                                 in_maps=in_maps, time_steps=time_steps)
    out = jax.block_until_ready(out)

    # Pure-JAX reference check.
    x = input_tensor.reshape(-1, in_maps, time_steps, 1)
    conv_ref = jnp.einsum("ncti,oc->noti", x, conv_w[:, :, 0, 0])
    inv_std = 1.0 / jnp.sqrt(bn_var + 1e-5)
    bn_ref = (conv_ref - bn_mean[None, :, None, None]) * (bn_gamma * inv_std)[None, :, None, None] \
             + bn_beta[None, :, None, None]
    ref = jnp.maximum(bn_ref + output_tensor, 0.0)
    assert out.shape == ref.shape
    assert jnp.allclose(out, ref, atol=1e-4, rtol=1e-4)

    print("KERNEL_OK")
</pallas_src>

<mosaic_0001>
module attributes {stable_mosaic.version = 11 : i64} {
  func.func @kernel(%arg0: i32, %arg1: i32, %arg2: memref<1x4x128xf32, #tpu.memory_space<vmem>>, %arg3: memref<8x4xf32, #tpu.memory_space<vmem>>, %arg4: memref<8x1xf32, #tpu.memory_space<vmem>>, %arg5: memref<1x8x128xf32, #tpu.memory_space<vmem>>, %arg6: memref<1x8x128xf32, #tpu.memory_space<vmem>>) attributes {dimension_semantics = [#tpu.dimension_semantics<parallel>, #tpu.dimension_semantics<parallel>], iteration_bounds = array<i64: 2, 1>, scalar_prefetch = 0 : i64, scratch_operands = 0 : i64, tpu.core_type = #tpu.core_type<tc>, window_params = [{transform_indices = @transform_0, window_bounds = array<i64: 1, 4, 128>}, {pipeline_mode = #tpu.pipeline_mode<synchronous>, transform_indices = @transform_1, window_bounds = array<i64: 8, 4>}, {pipeline_mode = #tpu.pipeline_mode<synchronous>, transform_indices = @transform_2, window_bounds = array<i64: 8, 1>}, {transform_indices = @transform_3, window_bounds = array<i64: 1, 8, 128>}, {transform_indices = @transform_4, window_bounds = array<i64: 1, 8, 128>}]} {
    %c0 = arith.constant 0 : index
    %c0_0 = arith.constant 0 : index
    %0 = vector.load %arg3[%c0, %c0_0] : memref<8x4xf32, #tpu.memory_space<vmem>>, vector<8x4xf32>
    %c0_1 = arith.constant 0 : index
    %c0_2 = arith.constant 0 : index
    %1 = vector.load %arg4[%c0_1, %c0_2] : memref<8x1xf32, #tpu.memory_space<vmem>>, vector<8x1xf32>
    %c0_3 = arith.constant 0 : index
    %c0_4 = arith.constant 0 : index
    %c0_5 = arith.constant 0 : index
    %2 = vector.load %arg2[%c0_3, %c0_4, %c0_5] : memref<1x4x128xf32, #tpu.memory_space<vmem>>, vector<1x4x128xf32>
    %3 = vector.shape_cast %2 : vector<1x4x128xf32> to vector<4x128xf32>
    %cst = arith.constant dense<0.000000e+00> : vector<8x128xf32>
    %4 = tpu.matmul %0, %3, %cst {dimension_numbers = #tpu.dot_dimension_numbers<[1], [0], [0], [1], [0, 0, 1, 1], [], []>} : vector<8x4xf32>, vector<4x128xf32>, vector<8x128xf32> -> vector<8x128xf32>
    %5 = vector.broadcast %1 : vector<8x1xf32> to vector<8x128xf32>
    %6 = arith.addf %4, %5 : vector<8x128xf32>
    %c0_6 = arith.constant 0 : index
    %c0_7 = arith.constant 0 : index
    %c0_8 = arith.constant 0 : index
    %7 = vector.load %arg5[%c0_6, %c0_7, %c0_8] : memref<1x8x128xf32, #tpu.memory_space<vmem>>, vector<1x8x128xf32>
    %8 = vector.shape_cast %7 : vector<1x8x128xf32> to vector<8x128xf32>
    %9 = arith.addf %6, %8 : vector<8x128xf32>
    %cst_9 = arith.constant 0.000000e+00 : f32
    %10 = vector.broadcast %cst_9 : f32 to vector<8x128xf32>
    %11 = arith.maximumf %9, %10 : vector<8x128xf32>
    %c0_10 = arith.constant 0 : index
    %c0_11 = arith.constant 0 : index
    %c0_12 = arith.constant 0 : index
    %12 = vector.load %arg6[%c0_10, %c0_11, %c0_12] : memref<1x8x128xf32, #tpu.memory_space<vmem>>, vector<1x8x128xf32>
    %13 = vector.shape_cast %12 : vector<1x8x128xf32> to vector<8x128xf32>
    %14 = vector.shape_cast %11 : vector<8x128xf32> to vector<1x8x128xf32>
    tpu.vector_store %arg6[%c0_10, %c0_11, %c0_12], %14 {strides = array<i32>} : memref<1x8x128xf32, #tpu.memory_space<vmem>>, vector<1x8x128xf32>,
    return
  }
  func.func @transform_0(%arg0: i32, %arg1: i32) -> (i32, i32, i32) {
    %c0_i32 = arith.constant 0 : i32
    %c0_i32_0 = arith.constant 0 : i32
    return %arg0, %c0_i32, %arg1 : i32, i32, i32
  }
  func.func @transform_1(%arg0: i32, %arg1: i32) -> (i32, i32) {
    %c0_i32 = arith.constant 0 : i32
    %c0_i32_0 = arith.constant 0 : i32
    %c0_i32_1 = arith.constant 0 : i32
    return %c0_i32, %c0_i32_0 : i32, i32
  }
  func.func @transform_2(%arg0: i32, %arg1: i32) -> (i32, i32) {
    %c0_i32 = arith.constant 0 : i32
    %c0_i32_0 = arith.constant 0 : i32
    %c0_i32_1 = arith.constant 0 : i32
    return %c0_i32, %c0_i32_0 : i32, i32
  }
  func.func @transform_3(%arg0: i32, %arg1: i32) -> (i32, i32, i32) {
    %c0_i32 = arith.constant 0 : i32
    %c0_i32_0 = arith.constant 0 : i32
    return %arg0, %c0_i32, %arg1 : i32, i32, i32
  }
  func.func @transform_4(%arg0: i32, %arg1: i32) -> (i32, i32, i32) {
    %c0_i32 = arith.constant 0 : i32
    %c0_i32_0 = arith.constant 0 : i32
    return %arg0, %c0_i32, %arg1 : i32, i32, i32
  }
}

</mosaic_0001>

<bundles_post_ra>
// kernel: tpu_custom_call.1
= control target key start
LH: loop header
LB: loop body
LE: loop exit
PB: predicated region body
PF: predicated region fallthrough
CT: control target
= control target key end

     0   :  { %9 = vsyncpa [#allocation3], 0  ;;  %s764_s0 = inlined_call_operand.hbm [shape: f32[2,4,128], index: 0, kind: input, shape index: {}]   ;;  %s765_s1 = inlined_call_operand.vmem [shape: f32[8,4], index: 1, kind: input, shape index: {}]   ;;  %s766_s2 = inlined_call_operand.vmem [shape: f32[8,1], index: 2, kind: input, shape index: {}]   ;;  %s767_s3 = inlined_call_operand.vmem [shape: f32[2,8,128], index: 3, kind: input, shape index: {}]   ;;  %s768_s4 = inlined_call_operand.hbm [shape: f32[2,8,128], index: 4, kind: output, shape index: {}]  }
   0x1   :  { %11 = vsyncpa [#allocation3 + $0x1], 0 }
   0x2   :  { %12 = vsyncpa [#allocation4], 0 }
   0x3   :  { %14 = vsyncpa [#allocation4 + $0x1], 0  ;;  %s632_s15 = smov 0   ;;  %s634_s16 = smov 0  }
   0x4   :  { %s636_s17 = smov 0   ;;  %s638_s18 = smov 0  }
   0x5   :  { %s640_s19 = smov 0   ;;  %s642_s20 = smov 0  }
   0x6 LB: > { %s412_s21 = sadd.s32 4294967295, %s604_s20   ;;  %s413_s22 = sadd.s32 4294967294, %s604_s20   ;;  %s604_s20 = sphi %s642_s20, %s20_s20   ;;  %s600_s19 = sphi %s640_s19, %s777_s19   ;;  %s596_s18 = sphi %s638_s18, %s776_s18   ;;  %s592_s17 = sphi %s636_s17, %s775_s17   ;;  %s588_s16 = sphi %s634_s16, %s774_s16   ;;  %s584_s15 = sphi %s632_s15, %s773_s15  }
   0x7   : > { %s32_s23 = sadd.s32 1, %s600_s19  ;;  %s41_s24 = sadd.s32 1, %s592_s17 }
   0x8   : > { %p34_p0 = scmp.ge.s32.totalorder %s32_s23, 2  ;;  %p48_p1 = scmp.ne.s32.totalorder %s592_s17, %s588_s16 }
   0x9   : > { %p49_p2 = scmp.eq.s32.totalorder %s604_s20, 0  ;;  %p54_p3 = scmp.ne.s32.totalorder %s588_s16, %s584_s15 }
   0xa   : > { %s779_s23 = smov (%p34_p0, %s32_s23), 0  ;;  %p55_p5 = scmp.eq.s32.totalorder %s412_s21, 0 }
   0xb   : > { %p673_p4 = por %p49_p2, %p48_p1  ;;  %s36_s26 = ssub.s32 %s600_s19, %s779_s23 }
   0xc   : > { %p150_p6 = scmp.eq.s32.totalorder %s412_s21, 1  ;;  %p39_p7 = scmp.eq.s32.totalorder %s36_s26, 0 }
   0xd   : > { %p679_p8 = por %p55_p5, %p54_p3  ;;  %p156_p10 = scmp.eq.s32.totalorder %s413_s22, 1 }
   0xe   : > { %p683_p9 = por %p150_p6, %p48_p1  ;;  %p415_p12 = scmp.ge.s32.totalorder %s604_s20, 2 }
   0xf   : > { %s688_s29 = scalar_select %p39_p7, %s592_s17, %s41_s24  }
  0x10   : > { %p690_p11 = por %p156_p10, %p54_p3  ;;  %p440_p13 = scmp.lt.s32.totalorder %s604_s20, 2 }
  0x11   : > { %s182_s5 = sand.u32 1, %s592_s17   ;;  %s417_s7 = sshll.u32 %s600_s19, 2 }
  0x12   : > { %s416_s6 = sshll.u32 %s182_s5, 2  ;;  %s191_s10 = scalar_lea.hbm %s764_s0, %s417_s7 }
  0x13   : > { %s186_s11 = scalar_lea.vmem [#allocation2], %s416_s6  ;;  %s193_s13 = sshll.u32 %s191_s10, 4  ;;  %s194_s13 = int_to_ptr.hbm [resolvable:$true] %s193_s13 }
  0x14   : > { %s195_s12 = sshll.u32 %s186_s11, 4  ;;  %p433_p0 = pnand %p440_p13, %p673_p4  ;;  %s196_s12 = int_to_ptr.vmem [resolvable:$true] %s195_s12 }
  0x15   : > { %p418_p1 = scmp.ge.s32.totalorder %s604_s20, 1  ;;  %p210_p2 = scmp.lt.s32.totalorder %s604_s20, 3 }
  0x16   : > { %s183_s14 = scalar_lea.sflag [#allocation3], %s182_s5 }
  0x17   : > { %435 = dma.hbm_to_vmem [thread:$0]  (!%p433_p0), %s194_s13, 64, %s196_s12, %s183_s14  }
  0x18   : > { %p211_p3 = pnand %p418_p1, %p210_p2 }
  0x19   : > { %s706_s21 = sand.u32 (!%p211_p3), 1, %s588_s16  }
  0x1a   : > { %214 = sbr.rel (%p211_p3) target bundleno = 169 (0xa9), region = 36  ;;  %s419_s22 = sshll.u32 (!%p211_p3), %s706_s21, 2 }
  0x1b   : > { %s217_s24 = scalar_lea.sflag (!%p211_p3), [#allocation3], %s706_s21  ;;  %s220_s26 = scalar_lea.vmem (!%p211_p3), [#allocation2], %s419_s22 }
  0x1f   : > { %575 = dma.done.wait (%p679_p8), %s217_s24, 64  }
  0x20   : > { %577 = vsyncadd (%p679_p8), %s217_s24, 4294967232  ;;  %v606_v0 = vmov 0   ;;  %vm272_vm0 = vcmask 1043456   ;;  %vm268_vm1 = vcmask 31744   ;;  %v262_v1 = vld [vmem:[%s220_s26] sm:$0xf] }
  0x21   : > { %491 = vset.pattern.permute.xlu0 %v606_v0  ;;  %v260_v2 = vld [vmem:[%s765_s1] sm:$0xff]  ;;  %422 = vmatpush.msk.msra.mxu0 %vm272_vm0, %v262_v1  ;;  %p253_p4 = scmp.lt.s32.totalorder %s596_s18, 1  ;;  %s420_s9 = sshll.u32 %s706_s21, 3 }
  0x22   : > { %v261_v3 = vld [vmem:[%s766_s2] sm:$0xff]  ;;  %423 = vmatmul.msk.f32.vlgmr.msra.gmra.mxu0 %vm268_vm1, %v260_v2  ;;  %s425_s10 = sshll.u32 %s596_s18, 3  ;;  %s252_s26 = scalar_lea.vmem [#allocation5], %s420_s9 }
  0x23   : > { %265 = vperm.xlu0 %491, %v261_v3   ;;  %s254_s27 = scalar_select %p253_p4, %s596_s18, 1 }
  0x24   : > { %s312_s24 = scalar_lea.hbm %s768_s4, %s425_s10  ;;  %s314_s25 = sshll.u32 %s252_s26, 4  ;;  %s315_s25 = int_to_ptr.vmem [resolvable:$true] %s314_s25 }
  0x25   : > { %s421_s8 = sshll.u32 %s254_s27, 3  ;;  %s316_s5 = sshll.u32 %s312_s24, 4  ;;  %s317_s5 = int_to_ptr.hbm [resolvable:$true] %s316_s5 }
  0x26   : > { %s259_s13 = scalar_lea.vmem %s767_s3, %s421_s8  ;;  %s301_s18 = scalar_lea.sflag [#allocation4], %s706_s21 }
  0x27   : > { %v296_v6 = vld [vmem:[%s259_s13] sm:$0xff]  ;;  %s536_s6 = sshra.s32 %s317_s5, 4  ;;  %s542_s10 = scalar_lea.hbm %s768_s4, 16  ;;  %s537_s6 = int_to_ptr.hbm [resolvable:$true] %s536_s6 }
  0x28   : > { %s538_s7 = scalar_lea.hbm %s537_s6, 8  ;;  %p543_p8 = scmp.lt.s32.totalorder %s537_s6, %s768_s4 }
  0x29   : > { %p539_p5 = scmp.ne.s32.totalorder %s537_s6, %s538_s7  ;;  %p544_p10 = scmp.lt.s32.totalorder %s542_s10, %s538_s7 }
  0x2b   : > { %p540_p6 = pnand %p539_p5, %p683_p9  ;;  %p545_p13 = por %p544_p10, %p543_p8 }
  0x2d   : > { %p541_p7 = pneg %p540_p6 }
  0x2f   : > { %p546_p0 = pnand %p545_p13, %p541_p7 }
  0x95   : > { %v266_v4 = vpop.permute.xlu0 %265 }
  0x9f   : > { %v293_v5 = vpop.f32.mrf.mxu0 }
  0xa0   : > { %v294_v7 = vadd.f32 %v293_v5, %v266_v4 }
  0xa2   : > { %v297_v8 = vadd.f32 %v296_v6, %v294_v7 }
  0xa4   : > { %v298_v9 = vmax.f32 %v297_v8, 0.0 }
  0xa6   : > { %299 = vst [vmem:[%s252_s26] sm:$0xff] %v298_v9 }
  0xa7   : > { %549 = shalt.err (!%p546_p0)
}
  0xa8   : > { %430 = dma.vmem_to_hbm [thread:$0]  (%p683_p9), %s315_s25, 128, %s317_s5, %s301_s18  }
  0xa9 PF: > { %s328_s21 = sand.u32 1, %s584_s15   ;;  %p437_p1 = pnand %p415_p12, %p690_p11 }
  0xaa   : > { %s329_s12 = scalar_lea.sflag [#allocation4], %s328_s21 }
  0xab   : > { %p438_p2 = pneg %p437_p1 }
  0xad   : > { %579 = dma.done.wait (%p438_p2), %s329_s12, 128  }
  0xae   : > { %581 = vsyncadd (%p438_p2), %s329_s12, 4294967168  ;;  %s20_s20 = sadd.s32 1, %s604_s20   ;;  %s773_s15 = smov %s588_s16 }
  0xaf   : > { %p17_p3 = scmp.ge.s32.totalorder %s20_s20, 4   ;;  %s774_s16 = smov %s592_s17 }
  0xb0   : > { %s775_s17 = smov %s688_s29  ;;  %s776_s18 = smov %s600_s19 }
  0xb1   : > { %s777_s19 = smov %s779_s23  ;;  %19 = sbr.rel (!%p17_p3) target bundleno = 6 (0x6), region = 84 }
  0xb6   :  { %335 = vsyncpa [#allocation3], 1 }
  0xb7   :  { %337 = vsyncpa [#allocation3 + $0x1], 1 }
  0xb8   :  { %338 = vsyncpa [#allocation4], 1 }
  0xb9   :  { %340 = vsyncpa [#allocation4 + $0x1], 1 }

</bundles_post_ra>
